<compile_context>
chip_gen: v7x
topology: tpu7x:2x2x1
jax: 0.10.0
libtpu: 0.0.40
codegen_flags: <defaults>
</compile_context>

<pallas_src>
import functools

import jax
import jax.numpy as jnp
from jax.experimental import pallas as pl
from jax.experimental.pallas import tpu as pltpu


def _logits_argmax_kernel(x_ref, w_ref, b_ref, idx_ref, max_sc, idx_sc, cols_sc):
    """Grid = (M tiles [parallel], vocab tiles [arbitrary, reduction last])."""
    j = pl.program_id(1)
    nv = pl.num_programs(1)
    tile_v = w_ref.shape[1]

    # Hot path: bf16 MXU matmul with f32 accumulation; bias added in f32.
    logits = jnp.dot(x_ref[...], w_ref[...],
                     preferred_element_type=jnp.float32) + b_ref[...]

    # Cache the local column iota once per M tile (idempotent across i tiles).
    @pl.when(j == 0)
    def _():
        cols_sc[...] = jax.lax.broadcasted_iota(jnp.int32, cols_sc.shape, 1)

    # Local max and first-occurrence argmax within this vocab tile.  The global
    # vocab offset is added to the reduced (tm, 1) result, not element-wise.
    local_max = jnp.max(logits, axis=-1, keepdims=True)
    sentinel = jnp.iinfo(jnp.int32).max
    local_idx = jnp.min(jnp.where(logits == local_max, cols_sc[...], sentinel),
                        axis=-1, keepdims=True) + j * tile_v
    # TODO(synk): NaN logits diverge from torch.argmax (sentinel/stale index);
    # matching torch's NaN propagation would need an extra isnan pass.

    @pl.when(j == 0)
    def _():
        max_sc[...] = local_max
        idx_sc[...] = local_idx

    @pl.when(j > 0)
    def _():
        better = local_max > max_sc[...]   # strict '>' keeps first occurrence
        max_sc[...] = jnp.where(better, local_max, max_sc[...])
        idx_sc[...] = jnp.where(better, local_idx, idx_sc[...])

    # Single finalize write of the output block per M tile.
    @pl.when(j == nv - 1)
    def _():
        idx_ref[...] = idx_sc[...]


def _round_up(x, m):
    return ((x + m - 1) // m) * m


def _vmem_estimate(tm, tv, d):
    """Rough VMEM bytes: double-buffered tiles + scratch + (tm, tv) temps."""
    tiles = 2 * (tm * d * 2 + d * tv * 2 + tv * 4 + tm * 4)   # bf16 x/w, f32 bias, i32 out
    scratch = tm * 4 + tm * 4 + tm * tv * 4                   # max, idx, cached iota
    temps = 3 * tm * tv * 4                                   # logits + mask + where
    return tiles + scratch + temps


@functools.partial(jax.jit, static_argnames=("tile_v", "tile_m"))
def embedding_to_logits(embeddings, weight_t, bias, *, tile_v=512, tile_m=512):
    """embeddings: (B, S, D) f32; weight_t: (D, V) f32; bias: (V,) f32.

    Returns argmax token ids (B, S) int32, matching
    torch.argmax(nn.Linear(D, V)(embeddings), dim=-1) (modulo the bf16 cast of
    the matmul operands — near-tie logits may differ from an f32 reference).
    """
    B, S, D = embeddings.shape
    V = weight_t.shape[1]
    M = B * S

    # Per-generation VMEM budget (v5e/v6e: 128 MiB, v7x: 64 MiB per core).
    try:
        vmem_cap = int(pltpu.get_tpu_info().vmem_capacity_bytes)
    except Exception:
        vmem_cap = 64 * 1024 * 1024            # v7x-safe fallback
    budget = int(0.70 * vmem_cap)

    M8 = _round_up(M, 8)
    tv0 = min(_round_up(tile_v, 128), _round_up(V, 128))

    def shrink_tv(tm, tv):
        while _vmem_estimate(tm, tv, D) > budget and tv > 128:
            tv = 128 * max(1, (tv // 128) // 2)
        return tv

    # Preferred layout: whole (padded) activation resident in one M tile so the
    # (D, V) weight streams from HBM exactly once (the dominant traffic term).
    tm, tv = M8, shrink_tv(M8, tv0)
    if _vmem_estimate(tm, tv, D) > budget and _round_up(tile_m, 128) < M8:
        # Fall back to tiling M; keep tm a multiple of 128 so multi-tile blocks
        # stay legal and lane-friendly.
        tm = min(_round_up(tile_m, 128), _round_up(M8, 128))
        tv = shrink_tv(tm, tv0)
        while _vmem_estimate(tm, tv, D) > budget and tm > 128:
            tm = 128 * max(1, (tm // 128) // 2)
            tv = shrink_tv(tm, tv0)
    # TODO(synk): on v7x (2 TCs) nm == 1 leaves one core idle; a vocab split
    # across cores with a tiny cross-TC combine would recover that 2x.

    M_pad = _round_up(M, tm)
    V_pad = _round_up(V, tv)
    nm = M_pad // tm
    nv = V_pad // tv

    # bf16 operands halve the dominant HBM weight stream; accumulation, bias
    # and the argmax bookkeeping stay in f32 / int32.
    x = embeddings.reshape(M, D).astype(jnp.bfloat16)
    if M_pad != M:
        x = jnp.pad(x, ((0, M_pad - M), (0, 0)))
    w = weight_t.astype(jnp.bfloat16)
    b = bias.astype(jnp.float32)
    if V_pad != V:
        w = jnp.pad(w, ((0, 0), (0, V_pad - V)))
        # -inf bias on padded vocab columns -> they can never win the argmax.
        b = jnp.pad(b, (0, V_pad - V), constant_values=-jnp.inf)
    b2 = b.reshape(1, V_pad)

    vmem_limit = int(min(max(int(_vmem_estimate(tm, tv, D) * 1.25),
                             32 * 1024 * 1024),
                         int(0.75 * vmem_cap)))

    idx = pl.pallas_call(
        _logits_argmax_kernel,
        out_shape=jax.ShapeDtypeStruct((M_pad, 1), jnp.int32),
        grid_spec=pltpu.PrefetchScalarGridSpec(
            num_scalar_prefetch=0,
            grid=(nm, nv),
            in_specs=[
                pl.BlockSpec((tm, D), lambda i, j: (i, 0)),      # activation
                pl.BlockSpec((D, tv), lambda i, j: (0, j)),      # weight tile
                pl.BlockSpec((1, tv), lambda i, j: (0, j)),      # bias tile
            ],
            out_specs=pl.BlockSpec((tm, 1), lambda i, j: (i, 0)),
            scratch_shapes=[
                pltpu.VMEM((tm, 1), jnp.float32),   # running max
                pltpu.VMEM((tm, 1), jnp.int32),     # running argmax
                pltpu.VMEM((tm, tv), jnp.int32),    # cached column iota
            ],
        ),
        compiler_params=pltpu.CompilerParams(
            dimension_semantics=("parallel", "arbitrary"),
            vmem_limit_bytes=vmem_limit),
    )(x, w, b2)

    return idx[:M, 0].reshape(B, S)


if __name__ == "__main__":
    # Small, module-consistent shapes.
    batch, seq, embedding_dim, vocab_size = 2, 8, 32, 256

    key = jax.random.PRNGKey(0)
    k_emb, k_w, k_b = jax.random.split(key, 3)

    embeddings = jax.random.normal(k_emb, (batch, seq, embedding_dim),
                                   dtype=jnp.float32)
    # nn.Linear(embedding_dim, vocab_size): weight (V, D), bias (V,)
    bound = 1.0 / jnp.sqrt(embedding_dim)
    weight = jax.random.uniform(k_w, (vocab_size, embedding_dim),
                                minval=-bound, maxval=bound, dtype=jnp.float32)
    bias = jax.random.uniform(k_b, (vocab_size,),
                              minval=-bound, maxval=bound, dtype=jnp.float32)
    weight_t = weight.T  # (D, V)

    token_ids = embedding_to_logits(embeddings, weight_t, bias)
    token_ids = jax.block_until_ready(token_ids)

    # Reference built with the same bf16 operand cast (f32 accumulation), so
    # the exact-match check is immune to bf16-vs-f32 near-tie flips.
    x_bf = embeddings.reshape(-1, embedding_dim).astype(jnp.bfloat16)
    ref_logits = jnp.dot(x_bf, weight_t.astype(jnp.bfloat16),
                         preferred_element_type=jnp.float32) + bias
    ref = jnp.argmax(ref_logits, axis=-1).astype(jnp.int32).reshape(batch, seq)

    assert token_ids.shape == (batch, seq)
    assert token_ids.dtype == jnp.int32
    assert bool(jnp.all(token_ids == ref))

    # Loose accuracy gate against the full-f32 (torch-equivalent) reference.
    ref_f32 = jnp.argmax(embeddings @ weight_t + bias, axis=-1).astype(jnp.int32)
    agreement = float(jnp.mean((token_ids == ref_f32).astype(jnp.float32)))
    assert agreement >= 0.85

    print("KERNEL_OK")
</pallas_src>

<mosaic_0001>
module attributes {stable_mosaic.version = 11 : i64} {
  func.func @_logits_argmax_kernel(%arg0: i32, %arg1: i32, %arg2: memref<16x32xbf16, #tpu.memory_space<vmem>>, %arg3: memref<32x256xbf16, #tpu.memory_space<vmem>>, %arg4: memref<1x256xf32, #tpu.memory_space<vmem>>, %arg5: memref<16x1xi32, #tpu.memory_space<vmem>>, %arg6: memref<16x1xf32, #tpu.memory_space<vmem>>, %arg7: memref<16x1xi32, #tpu.memory_space<vmem>>, %arg8: memref<16x256xi32, #tpu.memory_space<vmem>>) attributes {dimension_semantics = [#tpu.dimension_semantics<parallel>, #tpu.dimension_semantics<arbitrary>], iteration_bounds = array<i64: 1, 1>, scalar_prefetch = 0 : i64, scratch_operands = 3 : i64, tpu.core_type = #tpu.core_type<tc>, window_params = [{transform_indices = @transform_0, window_bounds = array<i64: 16, 32>}, {transform_indices = @transform_1, window_bounds = array<i64: 32, 256>}, {transform_indices = @transform_2, window_bounds = array<i64: 1, 256>}, {transform_indices = @transform_3, window_bounds = array<i64: 16, 1>}]} {
    %c0 = arith.constant 0 : index
    %c0_0 = arith.constant 0 : index
    %0 = vector.load %arg2[%c0, %c0_0] : memref<16x32xbf16, #tpu.memory_space<vmem>>, vector<16x32xbf16>
    %c0_1 = arith.constant 0 : index
    %c0_2 = arith.constant 0 : index
    %1 = vector.load %arg3[%c0_1, %c0_2] : memref<32x256xbf16, #tpu.memory_space<vmem>>, vector<32x256xbf16>
    %cst = arith.constant dense<0.000000e+00> : vector<16x256xf32>
    %2 = tpu.matmul %0, %1, %cst {dimension_numbers = #tpu.dot_dimension_numbers<[1], [0], [0], [1], [0, 0, 1, 1], [], []>} : vector<16x32xbf16>, vector<32x256xbf16>, vector<16x256xf32> -> vector<16x256xf32>
    %c0_3 = arith.constant 0 : index
    %c0_4 = arith.constant 0 : index
    %3 = vector.load %arg4[%c0_3, %c0_4] : memref<1x256xf32, #tpu.memory_space<vmem>>, vector<1x256xf32>
    %4 = vector.broadcast %3 : vector<1x256xf32> to vector<16x256xf32>
    %5 = arith.addf %2, %4 : vector<16x256xf32>
    %c0_i32 = arith.constant 0 : i32
    %6 = arith.cmpi eq, %arg1, %c0_i32 : i32
    %7 = arith.extui %6 : i1 to i32
    %c0_i32_5 = arith.constant 0 : i32
    %8 = arith.cmpi ne, %7, %c0_i32_5 : i32
    scf.if %8 {
      %30 = tpu.iota {dimensions = array<i32: 1>} : vector<16x256xi32>
      %c0_16 = arith.constant 0 : index
      %c0_17 = arith.constant 0 : index
      %31 = vector.load %arg8[%c0_16, %c0_17] : memref<16x256xi32, #tpu.memory_space<vmem>>, vector<16x256xi32>
      tpu.vector_store %arg8[%c0_16, %c0_17], %30 {strides = array<i32>} : memref<16x256xi32, #tpu.memory_space<vmem>>, vector<16x256xi32>,
    } else {
    }
    %cst_6 = arith.constant dense<0xFF800000> : vector<16xf32>
    %9 = vector.multi_reduction <maximumf>, %5, %cst_6 [1] : vector<16x256xf32> to vector<16xf32>
    %10 = vector.shape_cast %9 : vector<16xf32> to vector<16x1xf32>
    %11 = vector.broadcast %10 : vector<16x1xf32> to vector<16x256xf32>
    %12 = arith.cmpf oeq, %5, %11 : vector<16x256xf32>
    %c0_7 = arith.constant 0 : index
    %c0_8 = arith.constant 0 : index
    %13 = vector.load %arg8[%c0_7, %c0_8] : memref<16x256xi32, #tpu.memory_space<vmem>>, vector<16x256xi32>
    %c2147483647_i32 = arith.constant 2147483647 : i32
    %14 = vector.broadcast %c2147483647_i32 : i32 to vector<16x256xi32>
    %15 = arith.select %12, %13, %14 : vector<16x256xi1>, vector<16x256xi32>
    %cst_9 = arith.constant dense<2147483647> : vector<16xi32>
    %16 = vector.multi_reduction <minsi>, %15, %cst_9 [1] : vector<16x256xi32> to vector<16xi32>
    %17 = vector.shape_cast %16 : vector<16xi32> to vector<16x1xi32>
    %c256_i32 = arith.constant 256 : i32
    %18 = arith.muli %arg1, %c256_i32 : i32
    %19 = vector.broadcast %18 : i32 to vector<16x1xi32>
    %20 = arith.addi %17, %19 : vector<16x1xi32>
    %c0_i32_10 = arith.constant 0 : i32
    %21 = arith.cmpi eq, %arg1, %c0_i32_10 : i32
    %22 = arith.extui %21 : i1 to i32
    %c0_i32_11 = arith.constant 0 : i32
    %23 = arith.cmpi ne, %22, %c0_i32_11 : i32
    scf.if %23 {
      %c0_16 = arith.constant 0 : index
      %c0_17 = arith.constant 0 : index
      %30 = vector.load %arg6[%c0_16, %c0_17] : memref<16x1xf32, #tpu.memory_space<vmem>>, vector<16x1xf32>
      tpu.vector_store %arg6[%c0_16, %c0_17], %10 {strides = array<i32>} : memref<16x1xf32, #tpu.memory_space<vmem>>, vector<16x1xf32>,
      %c0_18 = arith.constant 0 : index
      %c0_19 = arith.constant 0 : index
      %31 = vector.load %arg7[%c0_18, %c0_19] : memref<16x1xi32, #tpu.memory_space<vmem>>, vector<16x1xi32>
      tpu.vector_store %arg7[%c0_18, %c0_19], %20 {strides = array<i32>} : memref<16x1xi32, #tpu.memory_space<vmem>>, vector<16x1xi32>,
    } else {
    }
    %c0_i32_12 = arith.constant 0 : i32
    %24 = arith.cmpi sgt, %arg1, %c0_i32_12 : i32
    %25 = arith.extui %24 : i1 to i32
    %c0_i32_13 = arith.constant 0 : i32
    %26 = arith.cmpi ne, %25, %c0_i32_13 : i32
    scf.if %26 {
      %c0_16 = arith.constant 0 : index
      %c0_17 = arith.constant 0 : index
      %30 = vector.load %arg6[%c0_16, %c0_17] : memref<16x1xf32, #tpu.memory_space<vmem>>, vector<16x1xf32>
      %31 = arith.cmpf ogt, %10, %30 : vector<16x1xf32>
      %c0_18 = arith.constant 0 : index
      %c0_19 = arith.constant 0 : index
      %32 = vector.load %arg6[%c0_18, %c0_19] : memref<16x1xf32, #tpu.memory_space<vmem>>, vector<16x1xf32>
      %33 = arith.select %31, %10, %32 : vector<16x1xi1>, vector<16x1xf32>
      %c0_20 = arith.constant 0 : index
      %c0_21 = arith.constant 0 : index
      %34 = vector.load %arg6[%c0_20, %c0_21] : memref<16x1xf32, #tpu.memory_space<vmem>>, vector<16x1xf32>
      tpu.vector_store %arg6[%c0_20, %c0_21], %33 {strides = array<i32>} : memref<16x1xf32, #tpu.memory_space<vmem>>, vector<16x1xf32>,
      %c0_22 = arith.constant 0 : index
      %c0_23 = arith.constant 0 : index
      %35 = vector.load %arg7[%c0_22, %c0_23] : memref<16x1xi32, #tpu.memory_space<vmem>>, vector<16x1xi32>
      %36 = arith.select %31, %20, %35 : vector<16x1xi1>, vector<16x1xi32>
      %c0_24 = arith.constant 0 : index
      %c0_25 = arith.constant 0 : index
      %37 = vector.load %arg7[%c0_24, %c0_25] : memref<16x1xi32, #tpu.memory_space<vmem>>, vector<16x1xi32>
      tpu.vector_store %arg7[%c0_24, %c0_25], %36 {strides = array<i32>} : memref<16x1xi32, #tpu.memory_space<vmem>>, vector<16x1xi32>,
    } else {
    }
    %c0_i32_14 = arith.constant 0 : i32
    %27 = arith.cmpi eq, %arg1, %c0_i32_14 : i32
    %28 = arith.extui %27 : i1 to i32
    %c0_i32_15 = arith.constant 0 : i32
    %29 = arith.cmpi ne, %28, %c0_i32_15 : i32
    scf.if %29 {
      %c0_16 = arith.constant 0 : index
      %c0_17 = arith.constant 0 : index
      %30 = vector.load %arg7[%c0_16, %c0_17] : memref<16x1xi32, #tpu.memory_space<vmem>>, vector<16x1xi32>
      %c0_18 = arith.constant 0 : index
      %c0_19 = arith.constant 0 : index
      %31 = vector.load %arg5[%c0_18, %c0_19] : memref<16x1xi32, #tpu.memory_space<vmem>>, vector<16x1xi32>
      tpu.vector_store %arg5[%c0_18, %c0_19], %30 {strides = array<i32>} : memref<16x1xi32, #tpu.memory_space<vmem>>, vector<16x1xi32>,
    } else {
    }
    return
  }
  func.func @transform_0(%arg0: i32, %arg1: i32) -> (i32, i32) {
    %c0_i32 = arith.constant 0 : i32
    %c0_i32_0 = arith.constant 0 : i32
    return %arg0, %c0_i32 : i32, i32
  }
  func.func @transform_1(%arg0: i32, %arg1: i32) -> (i32, i32) {
    %c0_i32 = arith.constant 0 : i32
    %c0_i32_0 = arith.constant 0 : i32
    return %c0_i32, %arg1 : i32, i32
  }
  func.func @transform_2(%arg0: i32, %arg1: i32) -> (i32, i32) {
    %c0_i32 = arith.constant 0 : i32
    %c0_i32_0 = arith.constant 0 : i32
    return %c0_i32, %arg1 : i32, i32
  }
  func.func @transform_3(%arg0: i32, %arg1: i32) -> (i32, i32) {
    %c0_i32 = arith.constant 0 : i32
    %c0_i32_0 = arith.constant 0 : i32
    return %arg0, %c0_i32 : i32, i32
  }
}

</mosaic_0001>

<bundles_post_ra>
// kernel: squeeze.1
= control target key start
LH: loop header
LB: loop body
LE: loop exit
PB: predicated region body
PF: predicated region fallthrough
CT: control target
= control target key end

     0   :  { %s85_s0 = inlined_call_operand.vmem [shape: s32[16], index: 0, kind: input, shape index: {}]   ;;  %s86_s1 = inlined_call_operand.hbm [shape: s32[2,8], index: 1, kind: output, shape index: {}]  }
   0x1   :  { %v5_v0 = vld [vmem:[%s85_s0] sm:$0x1] }
   0x2   :  { %2 = vsyncpa [#allocation1], 0  ;;  %6 = vst [vmem:[#allocation3] sm:$0x1] %v5_v0  ;;  %vm8_vm0 = vcmask 64512   ;;  %s58_s0 = smov 120  }
   0x3   :  { %s59_s8 = smov [#allocation0]  }
   0x4   :  { %s26_s9 = sshll.u32 %s59_s8, 4  ;;  %s27_s9 = int_to_ptr.vmem [resolvable:$true] %s26_s9 }
   0x5   :  { %s34_s10 = scalar_lea.vmem %s27_s9, 32  ;;  %p39_p1 = scmp.lt.s32.totalorder %s27_s9, %s27_s9 }
   0x6   :  { %p35_p0 = scmp.ne.s32.totalorder %s27_s9, %s34_s10  ;;  %p40_p2 = scmp.lt.s32.totalorder %s34_s10, %s34_s10 }
   0x8   :  { %p41_p3 = por %p40_p2, %p39_p1 }
   0x9   :  { %v10_v1 = vld [vmem:[#allocation3] sm:$0x1]  }
   0xa   :  { %v7_v2 = vld [vmem:[#allocation3] sm:$0x1]   ;;  %11 = vrot.lane.b32.xlu0 %v10_v1, %s58_s0  ;;  %p42_p4 = pnand %p41_p3, %p35_p0 }
   0xb   :  { %9 = vst.msk [vmem:[#allocation2] sm:$0x1] %vm8_vm0, %v7_v2  }
  0x7c   :  { %v12_v3 = vpop.permute.xlu0 %11  }
  0x7d   :  { %15 = vst.msk [vmem:[#allocation2 + $0x1] sm:$0x1] %vm8_vm0, %v12_v3  }
  0x84   :  { %v19_v4 = vld [vmem:[#allocation2] sm:$0x3] }
  0x85   :  { %21 = vst [vmem:[#allocation0] sm:$0x3] %v19_v4 }
  0x86   :  { %45 = shalt.err (!%p42_p4)
}
  0x87   :  { %s46_s13 = scalar_lea.hbm %s86_s1, 32 }
  0x88   :  { %p47_p5 = scmp.ne.s32.totalorder %s86_s1, %s46_s13  ;;  %p50_p6 = scmp.lt.u32.totalorder %s46_s13, %s86_s1 }
  0x8a   :  { %p52_p7 = pnand %p50_p6, %p47_p5 }
  0x8c   :  { %55 = shalt.err (!%p52_p7)
}
  0x8d   :  { %29 = dma.vmem_to_hbm [thread:$0]  %s27_s9, 32, %s86_s1, [#allocation1]  }
  0x8e   :  { %56 = dma.done.wait [#allocation1], 32  }
  0x8f   :  { %57 = vsyncadd [#allocation1], 4294967264 }
  0x90   :  { %31 = vsyncpa [#allocation1], 1 }

// kernel: embedding_to_logits.1
= control target key start
LH: loop header
LB: loop body
LE: loop exit
PB: predicated region body
PF: predicated region fallthrough
CT: control target
= control target key end

     0   :  { %v223_v1 = vmov 0   ;;  %vm58_vm0 = vcmask 261120   ;;  %v23_v6 = vlaneseq  ;;  %vm173_vm1 = vcmask 7168   ;;  %s272_s1 = inlined_call_operand.vmem [shape: bf16[32,256], index: 1, kind: input, shape index: {}]   ;;  %s273_s0 = inlined_call_operand.vmem [shape: bf16[16,32], index: 0, kind: input, shape index: {}]   ;;  %s274_s2 = inlined_call_operand.vmem [shape: f32[1,256], index: 2, kind: input, shape index: {}]   ;;  %s275_s3 = inlined_call_operand.vmem [shape: s32[16,1], index: 3, kind: output, shape index: {}]  }
   0x1   :  { %v216_v0 = vld [vmem:[%s272_s1 + $0x4] ss:$8 sps:$4 sm:$0xff]   ;;  %94 = vmatprep.mubr.bf16.mxu0 %v223_v1  ;;  %v218_v2 = vld [vmem:[%s272_s1] ss:$8 sps:$4 sm:$0xff]   ;;  %v219_v3 = vld [vmem:[%s272_s1 + $0x14] ss:$8 sps:$4 sm:$0xff]  }
   0x2   :  { %62 = vmatprep.subr.bf16.mxu0 %v216_v0  ;;  %v221_v4 = vld [vmem:[%s272_s1 + $0x10] ss:$8 sps:$4 sm:$0xff]   ;;  %v222_v5 = vld [vmem:[%s273_s0] sm:$0xff]   ;;  %v24_v7 = vshrl.u32 %v23_v6, 7  ;;  %v110_v23 = vand.u32 127, %v23_v6 }
   0x3   :  { %63 = vmatpush1.bf16.msra.mxu0 %v218_v2  ;;  %v21_v9 = vld [vmem:[%s274_s2] sm:$0x3] }
   0x4   :  { %64 = vmatprep.subr.bf16.mxu0 %v219_v3  ;;  %v25_v8 = vsub.s32 0, %v24_v7  ;;  %v29_v10 = vsub.s32 1, %v24_v7  ;;  %v111_v24 = vadd.s32 128, %v110_v23 }
   0x6   :  { %v26_v11 = vrot.slane %v21_v9, %v25_v8  ;;  %v30_v12 = vrot.slane %v21_v9, %v29_v10 }
   0x7   :  { %65 = vmatpush1.bf16.msra.mxu0 %v221_v4 }
   0xa   :  { %214 = vmatmul.mubr.msk.bf16.vlgmr.msra.gmra.mrb[0].mxu0 %vm58_vm0, %v222_v5 }
  0xdd   :  { %v96_v13 = vpop.f32.mrb[0].mxu0 }
  0xde   :  { %v97_v14 = vadd.f32 %v96_v13, %v26_v11  ;;  %v98_v15 = vpop.f32.mrb[1].mxu0 }
  0xdf   :  { %v99_v16 = vadd.f32 %v98_v15, %v30_v12  ;;  %v100_v17 = vpop.f32.mrb[2].mxu0 }
  0xe0   :  { %v102_v18 = vpop.f32.mrb[3].mxu0  ;;  %v101_v19 = vadd.f32 %v100_v17, %v26_v11 }
  0xe1   :  { %v103_v20 = vadd.f32 %v102_v18, %v30_v12  ;;  %v116_v21 = vmax.f32 %v97_v14, %v99_v16 }
  0xe3   :  { %117 = vmax.xlane.f32.xlu0 %v116_v21  ;;  %v119_v22 = vmax.f32 %v101_v19, %v103_v20 }
  0xe7   :  { %120 = vmax.xlane.f32.xlu0 %v119_v22 }
 0x170   :  { %v118_v25 = vpop.xlane.xlu0 %117 }
 0x171   :  { %vm122_vm2 = vcmp.eq.f32.partialorder %v97_v14, %v118_v25  ;;  %vm123_vm3 = vcmp.eq.f32.partialorder %v99_v16, %v118_v25 }
 0x172   :  { %v130_v26 = vsel %vm122_vm2, %v110_v23, 2147483647  ;;  %v131_v27 = vsel %vm123_vm3, %v111_v24, 2147483647 }
 0x173   :  { %vm134_vm4 = vcmp.lt.s32.totalorder %v130_v26, %v131_v27 }
 0x174   :  { %v121_v28 = vpop.xlane.xlu0 %120  ;;  %v135_v29 = vsel %vm134_vm4, %v130_v26, %v131_v27 }
 0x175   :  { %vm124_vm5 = vcmp.eq.f32.partialorder %v101_v19, %v121_v28  ;;  %vm125_vm6 = vcmp.eq.f32.partialorder %v103_v20, %v121_v28  ;;  %v137_v30 = vshra.s32 %v135_v29, 16  ;;  %v136_v37 = vand.u32 65535, %v135_v29 }
 0x176   :  { %v132_v31 = vsel %vm124_vm5, %v110_v23, 2147483647  ;;  %v133_v32 = vsel %vm125_vm6, %v111_v24, 2147483647 }
 0x177   :  { %v139_v33 = vcvt.s32.f32 %v137_v30  ;;  %vm150_vm7 = vcmp.lt.s32.totalorder %v132_v31, %v133_v32  ;;  %v138_v39 = vcvt.s32.f32 %v136_v37 }
 0x178   :  { %v151_v34 = vsel %vm150_vm7, %v132_v31, %v133_v32 }
 0x179   :  { %140 = vmin.xlane.f32.xlu1 %v139_v33  ;;  %v153_v35 = vshra.s32 %v151_v34, 16  ;;  %v152_v40 = vand.u32 65535, %v151_v34 }
 0x17b   :  { %v155_v36 = vcvt.s32.f32 %v153_v35  ;;  %v154_v43 = vcvt.s32.f32 %v152_v40 }
 0x17d   :  { %156 = vmin.xlane.f32.xlu1 %v155_v36 }
 0x206   :  { %v141_v38 = vpop.xlane.xlu1 %140 }
 0x207   :  { %vm142_vm8 = vcmp.eq.f32.partialorder %v139_v33, %v141_v38  ;;  %v147_v45 = vcvt.f32.s32 %v141_v38 }
 0x208   :  { %v143_v41 = vsel %vm142_vm8, %v138_v39, inf }
 0x209   :  { %144 = vmin.xlane.f32.xlu0 %v143_v41  ;;  %v148_v47 = vshll.u32 %v147_v45, 16 }
 0x20a   :  { %v157_v42 = vpop.xlane.xlu1 %156 }
 0x20b   :  { %vm158_vm9 = vcmp.eq.f32.partialorder %v155_v36, %v157_v42  ;;  %v163_v48 = vcvt.f32.s32 %v157_v42 }
 0x20c   :  { %v159_v44 = vsel %vm158_vm9, %v154_v43, inf }
 0x20d   :  { %160 = vmin.xlane.f32.xlu1 %v159_v44  ;;  %v164_v52 = vshll.u32 %v163_v48, 16 }
 0x296   :  { %v145_v46 = vpop.xlane.xlu0 %144 }
 0x297   :  { %v146_v49 = vcvt.f32.s32 %v145_v46 }
 0x299   :  { %v149_v50 = vadd.s32 %v148_v47, %v146_v49 }
 0x29a   :  { %v161_v51 = vpop.xlane.xlu1 %160 }
 0x29b   :  { %176 = vst.msk [vmem:[#allocation3] sm:$0xff] %vm173_vm1, %v149_v50  ;;  %v162_v53 = vcvt.f32.s32 %v161_v51 }
 0x29d   :  { %v165_v54 = vadd.s32 %v164_v52, %v162_v53 }
 0x29f   :  { %177 = vst.msk [vmem:[#allocation3 + $0x8] sm:$0xff] %vm173_vm1, %v165_v54 }
 0x2a2   :  { %v200_v55 = vld [vmem:[#allocation3] sm:$0xff] }
 0x2a3   :  { %203 = vst.msk [vmem:[%s275_s3] sm:$0xff] %vm173_vm1, %v200_v55 }
 0x2a6   :  { %v201_v56 = vld [vmem:[#allocation3 + $0x8] sm:$0xff] }
 0x2a7   :  { %204 = vst.msk [vmem:[%s275_s3 + $0x8] sm:$0xff] %vm173_vm1, %v201_v56 }

</bundles_post_ra>
